<compile_context>
chip_gen: v7x
topology: tpu7x:2x2x1
jax: 0.10.0
libtpu: 0.0.40
codegen_flags: <defaults>
</compile_context>

<pallas_src>
import jax
import jax.numpy as jnp
import numpy as np
from jax.experimental import pallas as pl
from jax.experimental.pallas import tpu as pltpu

_SUBLANE = 8          # output-channel chunk held on the sublane axis
_LANE_CHUNK = 512     # max lanes per register-resident accumulator chunk


def _spectral_mul_kernel(xr_ref, xi_ref, wr_ref, wi_ref, or_ref, oi_ref):
    """out[b, o, m] = sum_i x[b, i, m] * w[i, o, m]  (complex, split f32 planes).

    Block shapes (leading low/high grid dim already squeezed):
      xr/xi : (B, I, Mt)   input real / imag
      wr/wi : (I, O, Mt)   weight real / imag   (O is a multiple of 8)
      or/oi : (B, O, Mt)   output real / imag
    """
    B, I, Mt = xr_ref.shape
    O = wr_ref.shape[1]
    OC = _SUBLANE

    # Largest lane chunk (multiple of 128, <= _LANE_CHUNK) dividing Mt so the
    # per-chunk accumulators stay register resident.
    if Mt <= _LANE_CHUNK:
        LC = Mt
    else:
        LC = 128
        for cand in (_LANE_CHUNK, 384, 256):
            if Mt % cand == 0:
                LC = cand
                break
    n_oc = O // OC
    n_lc = Mt // LC

    def accumulate(b, o0, m0):
        # (1, OC, LC) register accumulators; a single store per chunk at the end.
        def body(i, carry):
            acc_r, acc_i = carry
            xr_i = xr_ref[pl.ds(b, 1), pl.ds(i, 1), pl.ds(m0, LC)]    # (1, 1, LC)
            xi_i = xi_ref[pl.ds(b, 1), pl.ds(i, 1), pl.ds(m0, LC)]
            wr_i = wr_ref[pl.ds(i, 1), pl.ds(o0, OC), pl.ds(m0, LC)]  # (1, OC, LC)
            wi_i = wi_ref[pl.ds(i, 1), pl.ds(o0, OC), pl.ds(m0, LC)]
            # exact 4-mul complex MAC (matches the reference einsum numerics)
            acc_r = acc_r + (xr_i * wr_i - xi_i * wi_i)
            acc_i = acc_i + (xr_i * wi_i + xi_i * wr_i)
            return acc_r, acc_i

        zeros = jnp.zeros((1, OC, LC), jnp.float32)
        if I <= 8:
            carry = (zeros, zeros)
            for i in range(I):                      # static unroll (compile-time)
                carry = body(i, carry)
        else:
            carry = jax.lax.fori_loop(0, I, body, (zeros, zeros), unroll=4)
        acc_r, acc_i = carry
        or_ref[pl.ds(b, 1), pl.ds(o0, OC), pl.ds(m0, LC)] = acc_r
        oi_ref[pl.ds(b, 1), pl.ds(o0, OC), pl.ds(m0, LC)] = acc_i

    @pl.loop(0, B)
    def _(b):
        for oc in range(n_oc):          # static: O is padded to a multiple of 8
            for lc in range(n_lc):      # static: Mt is a multiple of LC
                accumulate(b, oc * OC, lc * LC)


def _vmem_budgets():
    """(block budget for tile sizing, vmem_limit_bytes) per TPU generation."""
    cap = None
    try:
        cap = pltpu.get_tpu_info().vmem_capacity_bytes
    except Exception:
        cap = None
    if cap is not None and cap >= 100 * 1024 * 1024:     # v5e / v6e: 128 MiB VMEM
        return 64 * 1024 * 1024, 96 * 1024 * 1024
    return 24 * 1024 * 1024, 48 * 1024 * 1024            # v7x-safe (64 MiB / TC)


def _choose_m_tile(M, bytes_per_lane, vmem_budget):
    """Lane tile Mt (multiple of 128, double-buffered blocks within budget) and
    padded total Mp (multiple of Mt)."""
    Mp0 = ((M + 127) // 128) * 128            # lane-dense minimum
    Mt = min(Mp0, 8192)
    # BlockSpec double-buffers every operand: keep 2 * block bytes under budget.
    while Mt > 128 and 2 * bytes_per_lane * Mt > vmem_budget:
        Mt -= 128
    Mp = ((Mp0 + Mt - 1) // Mt) * Mt
    return Mt, Mp


def spectral_mul(xr, xi, wr, wi, Mt, vmem_limit):
    """xr/xi: (2, B, I, Mp) f32; wr/wi: (2, I, O, Mp) f32 (O multiple of 8,
    Mp multiple of Mt).  Returns (real, imag) planes of shape (2, B, O, Mp)."""
    _, B, I, Mp = xr.shape
    O = wr.shape[2]
    n_mt = Mp // Mt

    x_spec = pl.BlockSpec((None, B, I, Mt), lambda lh, mt: (lh, 0, 0, mt))
    w_spec = pl.BlockSpec((None, I, O, Mt), lambda lh, mt: (lh, 0, 0, mt))
    o_spec = pl.BlockSpec((None, B, O, Mt), lambda lh, mt: (lh, 0, 0, mt))

    return pl.pallas_call(
        _spectral_mul_kernel,
        grid=(2, n_mt),                       # total parallel steps = 2*n_mt >= 2
        in_specs=[x_spec, x_spec, w_spec, w_spec],
        out_specs=[o_spec, o_spec],
        out_shape=[
            jax.ShapeDtypeStruct((2, B, O, Mp), jnp.float32),
            jax.ShapeDtypeStruct((2, B, O, Mp), jnp.float32),
        ],
        compiler_params=pltpu.CompilerParams(
            dimension_semantics=("parallel", "parallel"),
            vmem_limit_bytes=vmem_limit,
        ),
    )(xr, xi, wr, wi)


class SpectralConv2d:
    """JAX/Pallas port of the PyTorch SpectralConv2d module (forward only)."""

    def __init__(self, in_channels, out_channels, num_vars, modes1, modes2, key):
        self.in_channels = in_channels
        self.out_channels = out_channels
        self.num_vars = num_vars
        self.modes1 = modes1
        self.modes2 = modes2
        self.scale = 1.0 / in_channels
        # out channels padded to full sublanes so kernel vregs are never <8 tall
        self.o_pad = ((out_channels + _SUBLANE - 1) // _SUBLANE) * _SUBLANE

        shp = (in_channels, out_channels, num_vars, modes1, modes2)
        k1, k2, k3, k4 = jax.random.split(key, 4)
        # torch.rand with a complex dtype draws real and imag parts U[0,1)
        self.weights1 = (self.scale * (jax.random.uniform(k1, shp)
                                       + 1j * jax.random.uniform(k2, shp))
                         ).astype(jnp.complex64)
        self.weights2 = (self.scale * (jax.random.uniform(k3, shp)
                                       + 1j * jax.random.uniform(k4, shp))
                         ).astype(jnp.complex64)
        self._w_cache = {}          # Mp -> padded f32 (wr, wi) planes

    def _weight_planes(self, Mp):
        """Cached f32 real/imag weight planes, padded to (2, I, o_pad, Mp)."""
        if Mp not in self._w_cache:
            I, O = self.in_channels, self.out_channels
            M = self.num_vars * self.modes1 * self.modes2
            w = jnp.stack([self.weights1, self.weights2], axis=0).reshape(2, I, O, M)
            wr = jnp.real(w).astype(jnp.float32)
            wi = jnp.imag(w).astype(jnp.float32)
            if self.o_pad > O or Mp > M:
                pad = ((0, 0), (0, 0), (0, self.o_pad - O), (0, Mp - M))
                wr = jnp.pad(wr, pad)
                wi = jnp.pad(wi, pad)
            self._w_cache[Mp] = (wr, wi)
        return self._w_cache[Mp]

    def __call__(self, x):
        B, Cin, V, H, W = x.shape
        m1, m2 = self.modes1, self.modes2
        Cout, Op = self.out_channels, self.o_pad
        Wf = W // 2 + 1
        M = V * m1 * m2

        # TODO(synk): rfft2/irfft2 remain plain JAX — there is no Pallas FFT
        # primitive; only the complex mode-mixing contraction runs in Pallas.
        x_ft = jnp.fft.rfft2(x)                                  # (B, Cin, V, H, Wf)
        low = x_ft[:, :, :, :m1, :m2]
        high = x_ft[:, :, :, -m1:, :m2]
        x_lh = jnp.stack([low, high], axis=0).reshape(2, B, Cin, M)

        # Generation-aware tile choice (2 weight planes, f32 everywhere).
        i_sub = ((Cin + _SUBLANE - 1) // _SUBLANE) * _SUBLANE
        bytes_per_lane = 4 * (2 * B * i_sub + 2 * Cin * Op + 2 * B * Op)
        budget, vmem_limit = _vmem_budgets()
        Mt, Mp = _choose_m_tile(M, bytes_per_lane, budget)

        xr = jnp.real(x_lh).astype(jnp.float32)
        xi = jnp.imag(x_lh).astype(jnp.float32)
        if Mp > M:
            lane_pad = ((0, 0), (0, 0), (0, 0), (0, Mp - M))
            xr = jnp.pad(xr, lane_pad)
            xi = jnp.pad(xi, lane_pad)
        wr, wi = self._weight_planes(Mp)                         # cached, padded

        out_r, out_i = spectral_mul(xr, xi, wr, wi, Mt, vmem_limit)
        out = (out_r[:, :, :Cout, :M]
               + 1j * out_i[:, :, :Cout, :M]).astype(jnp.complex64)
        out_low = out[0].reshape(B, Cout, V, m1, m2)
        out_high = out[1].reshape(B, Cout, V, m1, m2)

        # Assemble out_ft with concat + pad (avoids zero-init + two scatters).
        if H >= 2 * m1:
            mid = jnp.zeros((B, Cout, V, H - 2 * m1, m2), jnp.complex64)
            rows = jnp.concatenate([out_low, mid, out_high], axis=3)
        else:  # degenerate overlap case: fall back to the scatter form
            rows = jnp.zeros((B, Cout, V, H, m2), jnp.complex64)
            rows = rows.at[:, :, :, :m1, :].set(out_low)
            rows = rows.at[:, :, :, -m1:, :].set(out_high)
        out_ft = jnp.pad(rows, ((0, 0),) * 4 + ((0, Wf - m2),))

        return jnp.fft.irfft2(out_ft, s=(H, W))                  # (B, Cout, V, H, W)

    # pure-jnp reference of the full forward (for verification)
    def reference(self, x):
        B, Cin, V, H, W = x.shape
        m1, m2 = self.modes1, self.modes2
        x_ft = jnp.fft.rfft2(x)
        out_ft = jnp.zeros((B, self.out_channels, V, H, W // 2 + 1),
                           dtype=jnp.complex64)
        out_ft = out_ft.at[:, :, :, :m1, :m2].set(
            jnp.einsum('bivxy,iovxy->bovxy', x_ft[:, :, :, :m1, :m2], self.weights1))
        out_ft = out_ft.at[:, :, :, -m1:, :m2].set(
            jnp.einsum('bivxy,iovxy->bovxy', x_ft[:, :, :, -m1:, :m2], self.weights2))
        return jnp.fft.irfft2(out_ft, s=(H, W))


if __name__ == "__main__":
    key = jax.random.PRNGKey(0)
    k_x, k_w = jax.random.split(key)

    # small shapes: batch=2, in_channels=4, out_channels=4, num_vars=3,
    # modes1=modes2=4, spatial H=W=16
    B, Cin, Cout, V, m1, m2, H, W = 2, 4, 4, 3, 4, 4, 16, 16
    x = jax.random.normal(k_x, (B, Cin, V, H, W), dtype=jnp.float32)

    layer = SpectralConv2d(Cin, Cout, V, m1, m2, k_w)

    fwd = jax.jit(lambda a: layer(a))
    out = jax.block_until_ready(fwd(x))
    ref = jax.block_until_ready(layer.reference(x))

    assert out.shape == (B, Cout, V, H, W), out.shape
    assert np.allclose(np.asarray(out), np.asarray(ref), rtol=1e-4, atol=1e-5), \
        "Pallas result mismatch vs jnp reference"

    print("KERNEL_OK")
</pallas_src>

<mosaic_0001>
module attributes {stable_mosaic.version = 11 : i64} {
  func.func @_spectral_mul_kernel(%arg0: i32, %arg1: i32, %arg2: memref<1x2x4x128xf32, #tpu.memory_space<vmem>>, %arg3: memref<1x2x4x128xf32, #tpu.memory_space<vmem>>, %arg4: memref<1x4x8x128xf32, #tpu.memory_space<vmem>>, %arg5: memref<1x4x8x128xf32, #tpu.memory_space<vmem>>, %arg6: memref<1x2x8x128xf32, #tpu.memory_space<vmem>>, %arg7: memref<1x2x8x128xf32, #tpu.memory_space<vmem>>) attributes {dimension_semantics = [#tpu.dimension_semantics<parallel>, #tpu.dimension_semantics<parallel>], iteration_bounds = array<i64: 2, 1>, scalar_prefetch = 0 : i64, scratch_operands = 0 : i64, tpu.core_type = #tpu.core_type<tc>, window_params = [{transform_indices = @transform_0, window_bounds = array<i64: 1, 2, 4, 128>}, {transform_indices = @transform_1, window_bounds = array<i64: 1, 2, 4, 128>}, {transform_indices = @transform_2, window_bounds = array<i64: 1, 4, 8, 128>}, {transform_indices = @transform_3, window_bounds = array<i64: 1, 4, 8, 128>}, {transform_indices = @transform_4, window_bounds = array<i64: 1, 2, 8, 128>}, {transform_indices = @transform_5, window_bounds = array<i64: 1, 2, 8, 128>}]} {
    %c0_i32 = arith.constant 0 : i32
    %c2_i32 = arith.constant 2 : i32
    %0 = arith.addi %c0_i32, %c2_i32 : i32
    %c1_i32 = arith.constant 1 : i32
    scf.for %arg8 = %c0_i32 to %0 step %c1_i32  : i32 {
      %c1_i32_1 = arith.constant 1 : i32
      %1 = arith.muli %arg8, %c1_i32_1 : i32
      %c0_i32_2 = arith.constant 0 : i32
      %2 = arith.addi %c0_i32_2, %1 : i32
      %cst = arith.constant 0.000000e+00 : f32
      %3 = vector.broadcast %cst : f32 to vector<1x8x128xf32>
      %c0 = arith.constant 0 : index
      %4 = arith.index_cast %2 : i32 to index
      %c0_3 = arith.constant 0 : index
      %c0_4 = arith.constant 0 : index
      %5 = vector.load %arg2[%c0, %4, %c0_3, %c0_4] : memref<1x2x4x128xf32, #tpu.memory_space<vmem>>, vector<1x1x1x128xf32>
      %6 = vector.shape_cast %5 : vector<1x1x1x128xf32> to vector<1x1x128xf32>
      %c0_5 = arith.constant 0 : index
      %7 = arith.index_cast %2 : i32 to index
      %c0_6 = arith.constant 0 : index
      %c0_7 = arith.constant 0 : index
      %8 = vector.load %arg3[%c0_5, %7, %c0_6, %c0_7] : memref<1x2x4x128xf32, #tpu.memory_space<vmem>>, vector<1x1x1x128xf32>
      %9 = vector.shape_cast %8 : vector<1x1x1x128xf32> to vector<1x1x128xf32>
      %c0_8 = arith.constant 0 : index
      %c0_9 = arith.constant 0 : index
      %c0_10 = arith.constant 0 : index
      %c0_11 = arith.constant 0 : index
      %10 = vector.load %arg4[%c0_8, %c0_9, %c0_10, %c0_11] : memref<1x4x8x128xf32, #tpu.memory_space<vmem>>, vector<1x1x8x128xf32>
      %11 = vector.shape_cast %10 : vector<1x1x8x128xf32> to vector<1x8x128xf32>
      %c0_12 = arith.constant 0 : index
      %c0_13 = arith.constant 0 : index
      %c0_14 = arith.constant 0 : index
      %c0_15 = arith.constant 0 : index
      %12 = vector.load %arg5[%c0_12, %c0_13, %c0_14, %c0_15] : memref<1x4x8x128xf32, #tpu.memory_space<vmem>>, vector<1x1x8x128xf32>
      %13 = vector.shape_cast %12 : vector<1x1x8x128xf32> to vector<1x8x128xf32>
      %14 = vector.broadcast %6 : vector<1x1x128xf32> to vector<1x8x128xf32>
      %15 = arith.mulf %14, %11 : vector<1x8x128xf32>
      %16 = vector.broadcast %9 : vector<1x1x128xf32> to vector<1x8x128xf32>
      %17 = arith.mulf %16, %13 : vector<1x8x128xf32>
      %18 = arith.subf %15, %17 : vector<1x8x128xf32>
      %19 = arith.addf %3, %18 : vector<1x8x128xf32>
      %20 = vector.broadcast %6 : vector<1x1x128xf32> to vector<1x8x128xf32>
      %21 = arith.mulf %20, %13 : vector<1x8x128xf32>
      %22 = vector.broadcast %9 : vector<1x1x128xf32> to vector<1x8x128xf32>
      %23 = arith.mulf %22, %11 : vector<1x8x128xf32>
      %24 = arith.addf %21, %23 : vector<1x8x128xf32>
      %25 = arith.addf %3, %24 : vector<1x8x128xf32>
      %c0_16 = arith.constant 0 : index
      %26 = arith.index_cast %2 : i32 to index
      %c1 = arith.constant 1 : index
      %c0_17 = arith.constant 0 : index
      %27 = vector.load %arg2[%c0_16, %26, %c1, %c0_17] : memref<1x2x4x128xf32, #tpu.memory_space<vmem>>, vector<1x1x1x128xf32>
      %28 = vector.shape_cast %27 : vector<1x1x1x128xf32> to vector<1x1x128xf32>
      %c0_18 = arith.constant 0 : index
      %29 = arith.index_cast %2 : i32 to index
      %c1_19 = arith.constant 1 : index
      %c0_20 = arith.constant 0 : index
      %30 = vector.load %arg3[%c0_18, %29, %c1_19, %c0_20] : memref<1x2x4x128xf32, #tpu.memory_space<vmem>>, vector<1x1x1x128xf32>
      %31 = vector.shape_cast %30 : vector<1x1x1x128xf32> to vector<1x1x128xf32>
      %c0_21 = arith.constant 0 : index
      %c1_22 = arith.constant 1 : index
      %c0_23 = arith.constant 0 : index
      %c0_24 = arith.constant 0 : index
      %32 = vector.load %arg4[%c0_21, %c1_22, %c0_23, %c0_24] : memref<1x4x8x128xf32, #tpu.memory_space<vmem>>, vector<1x1x8x128xf32>
      %33 = vector.shape_cast %32 : vector<1x1x8x128xf32> to vector<1x8x128xf32>
      %c0_25 = arith.constant 0 : index
      %c1_26 = arith.constant 1 : index
      %c0_27 = arith.constant 0 : index
      %c0_28 = arith.constant 0 : index
      %34 = vector.load %arg5[%c0_25, %c1_26, %c0_27, %c0_28] : memref<1x4x8x128xf32, #tpu.memory_space<vmem>>, vector<1x1x8x128xf32>
      %35 = vector.shape_cast %34 : vector<1x1x8x128xf32> to vector<1x8x128xf32>
      %36 = vector.broadcast %28 : vector<1x1x128xf32> to vector<1x8x128xf32>
      %37 = arith.mulf %36, %33 : vector<1x8x128xf32>
      %38 = vector.broadcast %31 : vector<1x1x128xf32> to vector<1x8x128xf32>
      %39 = arith.mulf %38, %35 : vector<1x8x128xf32>
      %40 = arith.subf %37, %39 : vector<1x8x128xf32>
      %41 = arith.addf %19, %40 : vector<1x8x128xf32>
      %42 = vector.broadcast %28 : vector<1x1x128xf32> to vector<1x8x128xf32>
      %43 = arith.mulf %42, %35 : vector<1x8x128xf32>
      %44 = vector.broadcast %31 : vector<1x1x128xf32> to vector<1x8x128xf32>
      %45 = arith.mulf %44, %33 : vector<1x8x128xf32>
      %46 = arith.addf %43, %45 : vector<1x8x128xf32>
      %47 = arith.addf %25, %46 : vector<1x8x128xf32>
      %c0_29 = arith.constant 0 : index
      %48 = arith.index_cast %2 : i32 to index
      %c2 = arith.constant 2 : index
      %c0_30 = arith.constant 0 : index
      %49 = vector.load %arg2[%c0_29, %48, %c2, %c0_30] : memref<1x2x4x128xf32, #tpu.memory_space<vmem>>, vector<1x1x1x128xf32>
      %50 = vector.shape_cast %49 : vector<1x1x1x128xf32> to vector<1x1x128xf32>
      %c0_31 = arith.constant 0 : index
      %51 = arith.index_cast %2 : i32 to index
      %c2_32 = arith.constant 2 : index
      %c0_33 = arith.constant 0 : index
      %52 = vector.load %arg3[%c0_31, %51, %c2_32, %c0_33] : memref<1x2x4x128xf32, #tpu.memory_space<vmem>>, vector<1x1x1x128xf32>
      %53 = vector.shape_cast %52 : vector<1x1x1x128xf32> to vector<1x1x128xf32>
      %c0_34 = arith.constant 0 : index
      %c2_35 = arith.constant 2 : index
      %c0_36 = arith.constant 0 : index
      %c0_37 = arith.constant 0 : index
      %54 = vector.load %arg4[%c0_34, %c2_35, %c0_36, %c0_37] : memref<1x4x8x128xf32, #tpu.memory_space<vmem>>, vector<1x1x8x128xf32>
      %55 = vector.shape_cast %54 : vector<1x1x8x128xf32> to vector<1x8x128xf32>
      %c0_38 = arith.constant 0 : index
      %c2_39 = arith.constant 2 : index
      %c0_40 = arith.constant 0 : index
      %c0_41 = arith.constant 0 : index
      %56 = vector.load %arg5[%c0_38, %c2_39, %c0_40, %c0_41] : memref<1x4x8x128xf32, #tpu.memory_space<vmem>>, vector<1x1x8x128xf32>
      %57 = vector.shape_cast %56 : vector<1x1x8x128xf32> to vector<1x8x128xf32>
      %58 = vector.broadcast %50 : vector<1x1x128xf32> to vector<1x8x128xf32>
      %59 = arith.mulf %58, %55 : vector<1x8x128xf32>
      %60 = vector.broadcast %53 : vector<1x1x128xf32> to vector<1x8x128xf32>
      %61 = arith.mulf %60, %57 : vector<1x8x128xf32>
      %62 = arith.subf %59, %61 : vector<1x8x128xf32>
      %63 = arith.addf %41, %62 : vector<1x8x128xf32>
      %64 = vector.broadcast %50 : vector<1x1x128xf32> to vector<1x8x128xf32>
      %65 = arith.mulf %64, %57 : vector<1x8x128xf32>
      %66 = vector.broadcast %53 : vector<1x1x128xf32> to vector<1x8x128xf32>
      %67 = arith.mulf %66, %55 : vector<1x8x128xf32>
      %68 = arith.addf %65, %67 : vector<1x8x128xf32>
      %69 = arith.addf %47, %68 : vector<1x8x128xf32>
      %c0_42 = arith.constant 0 : index
      %70 = arith.index_cast %2 : i32 to index
      %c3 = arith.constant 3 : index
      %c0_43 = arith.constant 0 : index
      %71 = vector.load %arg2[%c0_42, %70, %c3, %c0_43] : memref<1x2x4x128xf32, #tpu.memory_space<vmem>>, vector<1x1x1x128xf32>
      %72 = vector.shape_cast %71 : vector<1x1x1x128xf32> to vector<1x1x128xf32>
      %c0_44 = arith.constant 0 : index
      %73 = arith.index_cast %2 : i32 to index
      %c3_45 = arith.constant 3 : index
      %c0_46 = arith.constant 0 : index
      %74 = vector.load %arg3[%c0_44, %73, %c3_45, %c0_46] : memref<1x2x4x128xf32, #tpu.memory_space<vmem>>, vector<1x1x1x128xf32>
      %75 = vector.shape_cast %74 : vector<1x1x1x128xf32> to vector<1x1x128xf32>
      %c0_47 = arith.constant 0 : index
      %c3_48 = arith.constant 3 : index
      %c0_49 = arith.constant 0 : index
      %c0_50 = arith.constant 0 : index
      %76 = vector.load %arg4[%c0_47, %c3_48, %c0_49, %c0_50] : memref<1x4x8x128xf32, #tpu.memory_space<vmem>>, vector<1x1x8x128xf32>
      %77 = vector.shape_cast %76 : vector<1x1x8x128xf32> to vector<1x8x128xf32>
      %c0_51 = arith.constant 0 : index
      %c3_52 = arith.constant 3 : index
      %c0_53 = arith.constant 0 : index
      %c0_54 = arith.constant 0 : index
      %78 = vector.load %arg5[%c0_51, %c3_52, %c0_53, %c0_54] : memref<1x4x8x128xf32, #tpu.memory_space<vmem>>, vector<1x1x8x128xf32>
      %79 = vector.shape_cast %78 : vector<1x1x8x128xf32> to vector<1x8x128xf32>
      %80 = vector.broadcast %72 : vector<1x1x128xf32> to vector<1x8x128xf32>
      %81 = arith.mulf %80, %77 : vector<1x8x128xf32>
      %82 = vector.broadcast %75 : vector<1x1x128xf32> to vector<1x8x128xf32>
      %83 = arith.mulf %82, %79 : vector<1x8x128xf32>
      %84 = arith.subf %81, %83 : vector<1x8x128xf32>
      %85 = arith.addf %63, %84 : vector<1x8x128xf32>
      %86 = vector.broadcast %72 : vector<1x1x128xf32> to vector<1x8x128xf32>
      %87 = arith.mulf %86, %79 : vector<1x8x128xf32>
      %88 = vector.broadcast %75 : vector<1x1x128xf32> to vector<1x8x128xf32>
      %89 = arith.mulf %88, %77 : vector<1x8x128xf32>
      %90 = arith.addf %87, %89 : vector<1x8x128xf32>
      %91 = arith.addf %69, %90 : vector<1x8x128xf32>
      %c0_55 = arith.constant 0 : index
      %92 = arith.index_cast %2 : i32 to index
      %c0_56 = arith.constant 0 : index
      %c0_57 = arith.constant 0 : index
      %93 = vector.load %arg6[%c0_55, %92, %c0_56, %c0_57] : memref<1x2x8x128xf32, #tpu.memory_space<vmem>>, vector<1x1x8x128xf32>
      %94 = vector.shape_cast %93 : vector<1x1x8x128xf32> to vector<1x8x128xf32>
      %95 = vector.shape_cast %85 : vector<1x8x128xf32> to vector<1x1x8x128xf32>
      tpu.vector_store %arg6[%c0_55, %92, %c0_56, %c0_57], %95 {strides = array<i32>} : memref<1x2x8x128xf32, #tpu.memory_space<vmem>>, vector<1x1x8x128xf32>,
      %c0_58 = arith.constant 0 : index
      %96 = arith.index_cast %2 : i32 to index
      %c0_59 = arith.constant 0 : index
      %c0_60 = arith.constant 0 : index
      %97 = vector.load %arg7[%c0_58, %96, %c0_59, %c0_60] : memref<1x2x8x128xf32, #tpu.memory_space<vmem>>, vector<1x1x8x128xf32>
      %98 = vector.shape_cast %97 : vector<1x1x8x128xf32> to vector<1x8x128xf32>
      %99 = vector.shape_cast %91 : vector<1x8x128xf32> to vector<1x1x8x128xf32>
      tpu.vector_store %arg7[%c0_58, %96, %c0_59, %c0_60], %99 {strides = array<i32>} : memref<1x2x8x128xf32, #tpu.memory_space<vmem>>, vector<1x1x8x128xf32>,
    }
    %c2_i32_0 = arith.constant 2 : i32
    return
  }
  func.func @transform_0(%arg0: i32, %arg1: i32) -> (i32, i32, i32, i32) {
    %c0_i32 = arith.constant 0 : i32
    %c0_i32_0 = arith.constant 0 : i32
    %c0_i32_1 = arith.constant 0 : i32
    return %arg0, %c0_i32, %c0_i32_0, %arg1 : i32, i32, i32, i32
  }
  func.func @transform_1(%arg0: i32, %arg1: i32) -> (i32, i32, i32, i32) {
    %c0_i32 = arith.constant 0 : i32
    %c0_i32_0 = arith.constant 0 : i32
    %c0_i32_1 = arith.constant 0 : i32
    return %arg0, %c0_i32, %c0_i32_0, %arg1 : i32, i32, i32, i32
  }
  func.func @transform_2(%arg0: i32, %arg1: i32) -> (i32, i32, i32, i32) {
    %c0_i32 = arith.constant 0 : i32
    %c0_i32_0 = arith.constant 0 : i32
    %c0_i32_1 = arith.constant 0 : i32
    return %arg0, %c0_i32, %c0_i32_0, %arg1 : i32, i32, i32, i32
  }
  func.func @transform_3(%arg0: i32, %arg1: i32) -> (i32, i32, i32, i32) {
    %c0_i32 = arith.constant 0 : i32
    %c0_i32_0 = arith.constant 0 : i32
    %c0_i32_1 = arith.constant 0 : i32
    return %arg0, %c0_i32, %c0_i32_0, %arg1 : i32, i32, i32, i32
  }
  func.func @transform_4(%arg0: i32, %arg1: i32) -> (i32, i32, i32, i32) {
    %c0_i32 = arith.constant 0 : i32
    %c0_i32_0 = arith.constant 0 : i32
    %c0_i32_1 = arith.constant 0 : i32
    return %arg0, %c0_i32, %c0_i32_0, %arg1 : i32, i32, i32, i32
  }
  func.func @transform_5(%arg0: i32, %arg1: i32) -> (i32, i32, i32, i32) {
    %c0_i32 = arith.constant 0 : i32
    %c0_i32_0 = arith.constant 0 : i32
    %c0_i32_1 = arith.constant 0 : i32
    return %arg0, %c0_i32, %c0_i32_0, %arg1 : i32, i32, i32, i32
  }
}

</mosaic_0001>

<bundles_post_ra>
// kernel: squeeze.2
= control target key start
LH: loop header
LB: loop body
LE: loop exit
PB: predicated region body
PF: predicated region fallthrough
CT: control target
= control target key end

     0   :  { %s351_s10 = smov 116   ;;  %vm11_vm0 = vcmask 31744   ;;  %s352_s11 = smov 120   ;;  %s495_s0 = inlined_call_operand.vmem [shape: f32[1,2,4,48], index: 0, kind: input, shape index: {}]   ;;  %s496_s1 = inlined_call_operand.vmem [shape: f32[2,4,3,4,4], index: 1, kind: output, shape index: {}]  }
   0x1   :  { %v315_v0 = vld [vmem:[%s495_s0 + $0x4] sm:$0xf]  ;;  %v8_v1 = vld [vmem:[%s495_s0] sm:$0xf]  ;;  %s350_s0 = smov 124   ;;  %s353_s12 = smov 112  }
   0x2   :  { %7 = vst [vmem:[#allocation1 + $0x8] sm:$0xf] %v315_v0  ;;  %9 = vst [vmem:[#allocation1] sm:$0xf] %v8_v1  ;;  %s354_s13 = smov 108   ;;  %s355_s14 = smov 104  }
   0x3   :  { %s356_s15 = smov 100   ;;  %s357_s16 = smov 96  }
   0x4   :  { %s358_s17 = smov 92   ;;  %s359_s18 = smov 88  }
   0x5   :  { %s360_s19 = smov 84  }
   0x9   :  { %v18_v2 = vld.sshfl [vmem:[#allocation1] sm:$0xff pattern:$0x9ab81230]  }
   0xa   :  { %19 = vrot.lane.b32.xlu0 %v18_v2, %s350_s0  ;;  %43 = vrot.lane.b32.xlu1 %v18_v2, %s351_s10  ;;  %v14_v3 = vld [vmem:[#allocation1 + $0x8] sm:$0xf]   ;;  %v10_v5 = vld [vmem:[#allocation1] sm:$0xf]  }
   0xb   :  { %v54_v4 = vld.sshfl [vmem:[#allocation1] sm:$0xff pattern:$0xab892301]   ;;  %17 = vst.msk [vmem:[#allocation0 + $0x60] ss:$24 sm:$0xf] %vm11_vm0, %v14_v3  }
   0xc   :  { %12 = vst.msk [vmem:[#allocation0] ss:$24 sm:$0xf] %vm11_vm0, %v10_v5   ;;  %v102_v6 = vld.sshfl [vmem:[#allocation1] sm:$0xff pattern:$0xb89a3012]  }
   0xe   :  { %31 = vrot.lane.b32.xlu0 %v18_v2, %s352_s11  ;;  %55 = vrot.lane.b32.xlu1 %v54_v4, %s353_s12 }
  0x12   :  { %67 = vrot.lane.b32.xlu0 %v54_v4, %s354_s13  ;;  %79 = vrot.lane.b32.xlu1 %v54_v4, %s355_s14 }
  0x16   :  { %91 = vrot.lane.b32.xlu0 %v54_v4, %s356_s15  ;;  %103 = vrot.lane.b32.xlu1 %v102_v6, %s357_s16 }
  0x1a   :  { %115 = vrot.lane.b32.xlu0 %v102_v6, %s358_s17  ;;  %127 = vrot.lane.b32.xlu1 %v102_v6, %s359_s18 }
  0x1e   :  { %139 = vrot.lane.b32.xlu0 %v102_v6, %s360_s19 }
  0x7c   :  { %v20_v7 = vpop.permute.xlu0 %19   ;;  %v44_v8 = vpop.permute.xlu1 %43  }
  0x7d   :  { %23 = vst.msk [vmem:[#allocation0 + $0x1] ss:$72 sm:$0x3] %vm11_vm0, %v20_v7   ;;  %25 = vst.msk [vmem:[#allocation0 + $0x61] ss:$-24 sm:$0xc] %vm11_vm0, %v20_v7  }
  0x7e   :  { %27 = vst.msk [vmem:[#allocation0 - $0xbf] ss:$72 sm:$0x30] %vm11_vm0, %v20_v7   ;;  %29 = vst.msk [vmem:[#allocation0 + $0x121] ss:$-24 sm:$0xc0] %vm11_vm0, %v20_v7  }
  0x7f   :  { %47 = vst.msk [vmem:[#allocation0 + $0x3] ss:$72 sm:$0x3] %vm11_vm0, %v44_v8   ;;  %49 = vst.msk [vmem:[#allocation0 + $0x63] ss:$-24 sm:$0xc] %vm11_vm0, %v44_v8  }
  0x80   :  { %51 = vst.msk [vmem:[#allocation0 - $0xbd] ss:$72 sm:$0x30] %vm11_vm0, %v44_v8   ;;  %53 = vst.msk [vmem:[#allocation0 + $0x123] ss:$-24 sm:$0xc0] %vm11_vm0, %v44_v8   ;;  %v32_v9 = vpop.permute.xlu0 %31   ;;  %v56_v10 = vpop.permute.xlu1 %55  }
  0x81   :  { %35 = vst.msk [vmem:[#allocation0 + $0x2] ss:$72 sm:$0x3] %vm11_vm0, %v32_v9   ;;  %37 = vst.msk [vmem:[#allocation0 + $0x62] ss:$-24 sm:$0xc] %vm11_vm0, %v32_v9  }
  0x82   :  { %39 = vst.msk [vmem:[#allocation0 - $0xbe] ss:$72 sm:$0x30] %vm11_vm0, %v32_v9   ;;  %41 = vst.msk [vmem:[#allocation0 + $0x122] ss:$-24 sm:$0xc0] %vm11_vm0, %v32_v9  }
  0x83   :  { %59 = vst.msk [vmem:[#allocation0 + $0x20] ss:$-24 sm:$0x3] %vm11_vm0, %v56_v10   ;;  %61 = vst.msk [vmem:[#allocation0 + $0x80] ss:$-24 sm:$0xc] %vm11_vm0, %v56_v10  }
  0x84   :  { %63 = vst.msk [vmem:[#allocation0 + $0xe0] ss:$-24 sm:$0x30] %vm11_vm0, %v56_v10   ;;  %65 = vst.msk [vmem:[#allocation0 + $0x140] ss:$-24 sm:$0xc0] %vm11_vm0, %v56_v10   ;;  %v68_v11 = vpop.permute.xlu0 %67   ;;  %v80_v12 = vpop.permute.xlu1 %79  }
  0x85   :  { %71 = vst.msk [vmem:[#allocation0 + $0x21] ss:$-24 sm:$0x3] %vm11_vm0, %v68_v11   ;;  %73 = vst.msk [vmem:[#allocation0 + $0x81] ss:$-24 sm:$0xc] %vm11_vm0, %v68_v11  }
  0x86   :  { %75 = vst.msk [vmem:[#allocation0 + $0xe1] ss:$-24 sm:$0x30] %vm11_vm0, %v68_v11   ;;  %77 = vst.msk [vmem:[#allocation0 + $0x141] ss:$-24 sm:$0xc0] %vm11_vm0, %v68_v11  }
  0x87   :  { %83 = vst.msk [vmem:[#allocation0 + $0x22] ss:$-24 sm:$0x3] %vm11_vm0, %v80_v12   ;;  %85 = vst.msk [vmem:[#allocation0 + $0x82] ss:$-24 sm:$0xc] %vm11_vm0, %v80_v12  }
  0x88   :  { %87 = vst.msk [vmem:[#allocation0 + $0xe2] ss:$-24 sm:$0x30] %vm11_vm0, %v80_v12   ;;  %89 = vst.msk [vmem:[#allocation0 + $0x142] ss:$-24 sm:$0xc0] %vm11_vm0, %v80_v12   ;;  %v92_v16 = vpop.permute.xlu0 %91   ;;  %v104_v17 = vpop.permute.xlu1 %103  }
  0x89   :  { %v153_v13 = vld [vmem:[#allocation0] sm:$0xf]  ;;  %v168_v14 = vld [vmem:[#allocation0 + $0x18] sm:$0xf]  ;;  %v186_v15 = vld [vmem:[#allocation0 + $0x30] sm:$0xf] }
  0x8a   :  { %155 = vst [vmem:[%s496_s1] sm:$0xf] %v153_v13  ;;  %318 = vst [vmem:[%s496_s1 + $0xc] sm:$0xf] %v168_v14  ;;  %v204_v18 = vld [vmem:[#allocation0 + $0x48] sm:$0xf] }
  0x8b   :  { %321 = vst [vmem:[%s496_s1 + $0x18] sm:$0xf] %v186_v15  ;;  %v222_v19 = vld [vmem:[#allocation0 + $0x60] sm:$0xf]  ;;  %v276_v20 = vld [vmem:[#allocation0 + $0xa8] sm:$0xf] }
  0x8c   :  { %95 = vst.msk [vmem:[#allocation0 + $0x23] ss:$-24 sm:$0x3] %vm11_vm0, %v92_v16   ;;  %97 = vst.msk [vmem:[#allocation0 + $0x83] ss:$-24 sm:$0xc] %vm11_vm0, %v92_v16   ;;  %v116_v23 = vpop.permute.xlu0 %115   ;;  %v128_v24 = vpop.permute.xlu1 %127  }
  0x8d   :  { %99 = vst.msk [vmem:[#allocation0 + $0xe3] ss:$-24 sm:$0x30] %vm11_vm0, %v92_v16   ;;  %101 = vst.msk [vmem:[#allocation0 + $0x143] ss:$-24 sm:$0xc0] %vm11_vm0, %v92_v16  }
  0x8e   :  { %107 = vst.msk [vmem:[#allocation0 + $0x40] ss:$-24 sm:$0x7] %vm11_vm0, %v104_v17   ;;  %109 = vst.msk [vmem:[#allocation0 - $0x80] ss:$72 sm:$0x18] %vm11_vm0, %v104_v17  }
  0x8f   :  { %111 = vst.msk [vmem:[#allocation0 + $0x100] ss:$-24 sm:$0x60] %vm11_vm0, %v104_v17   ;;  %113 = vst.msk [vmem:[#allocation0 + $0xb1] sm:$0x80] %vm11_vm0, %v104_v17  }
  0x90   :  { %324 = vst [vmem:[%s496_s1 + $0x24] sm:$0xf] %v204_v18  ;;  %327 = vst [vmem:[%s496_s1 + $0x30] sm:$0xf] %v222_v19  ;;  %v240_v21 = vld [vmem:[#allocation0 + $0x78] sm:$0xf]  ;;  %v140_v28 = vpop.permute.xlu0 %139  }
  0x91   :  { %336 = vst [vmem:[%s496_s1 + $0x54] sm:$0xf] %v276_v20  ;;  %v258_v22 = vld [vmem:[#allocation0 + $0x90] sm:$0xf]  ;;  %330 = vst [vmem:[%s496_s1 + $0x3c] sm:$0xf] %v240_v21 }
  0x92   :  { %333 = vst [vmem:[%s496_s1 + $0x48] sm:$0xf] %v258_v22  ;;  %119 = vst.msk [vmem:[#allocation0 + $0x41] ss:$-24 sm:$0x7] %vm11_vm0, %v116_v23  }
  0x93   :  { %121 = vst.msk [vmem:[#allocation0 - $0x7f] ss:$72 sm:$0x18] %vm11_vm0, %v116_v23   ;;  %123 = vst.msk [vmem:[#allocation0 + $0x101] ss:$-24 sm:$0x60] %vm11_vm0, %v116_v23  }
  0x94   :  { %125 = vst.msk [vmem:[#allocation0 + $0xb2] sm:$0x80] %vm11_vm0, %v116_v23   ;;  %131 = vst.msk [vmem:[#allocation0 + $0x42] ss:$-24 sm:$0x7] %vm11_vm0, %v128_v24  }
  0x95   :  { %133 = vst.msk [vmem:[#allocation0 - $0x7e] ss:$72 sm:$0x18] %vm11_vm0, %v128_v24   ;;  %135 = vst.msk [vmem:[#allocation0 + $0x102] ss:$-24 sm:$0x60] %vm11_vm0, %v128_v24  }
  0x96   :  { %137 = vst.msk [vmem:[#allocation0 + $0xb3] sm:$0x80] %vm11_vm0, %v128_v24   ;;  %v192_v25 = vld [vmem:[#allocation0 + $0x38] sm:$0xf]  ;;  %v210_v26 = vld [vmem:[#allocation0 + $0x50] sm:$0xf] }
  0x97   :  { %v157_v27 = vld [vmem:[#allocation0 + $0x8] sm:$0xf]  ;;  %322 = vst [vmem:[%s496_s1 + $0x1c] sm:$0xf] %v192_v25  ;;  %325 = vst [vmem:[%s496_s1 + $0x28] sm:$0xf] %v210_v26 }
  0x98   :  { %v174_v29 = vld [vmem:[#allocation0 + $0x20] sm:$0xf]  ;;  %v228_v30 = vld [vmem:[#allocation0 + $0x68] sm:$0xf]  ;;  %316 = vst [vmem:[%s496_s1 + $0x4] sm:$0xf] %v157_v27 }
  0x99   :  { %v246_v31 = vld [vmem:[#allocation0 + $0x80] sm:$0xf]  ;;  %143 = vst.msk [vmem:[#allocation0 + $0x43] ss:$-24 sm:$0x7] %vm11_vm0, %v140_v28  }
  0x9a   :  { %145 = vst.msk [vmem:[#allocation0 - $0x7d] ss:$72 sm:$0x18] %vm11_vm0, %v140_v28   ;;  %147 = vst.msk [vmem:[#allocation0 + $0x103] ss:$-24 sm:$0x60] %vm11_vm0, %v140_v28  }
  0x9b   :  { %149 = vst.msk [vmem:[#allocation0 + $0xb4] sm:$0x80] %vm11_vm0, %v140_v28   ;;  %v264_v32 = vld [vmem:[#allocation0 + $0x98] sm:$0xf]  ;;  %v282_v33 = vld [vmem:[#allocation0 + $0xb0] sm:$0xf] }
  0x9c   :  { %319 = vst [vmem:[%s496_s1 + $0x10] sm:$0xf] %v174_v29  ;;  %328 = vst [vmem:[%s496_s1 + $0x34] sm:$0xf] %v228_v30 }
  0x9d   :  { %331 = vst [vmem:[%s496_s1 + $0x40] sm:$0xf] %v246_v31  ;;  %334 = vst [vmem:[%s496_s1 + $0x4c] sm:$0xf] %v264_v32 }
  0x9e   :  { %337 = vst [vmem:[%s496_s1 + $0x58] sm:$0xf] %v282_v33 }
  0xa0   :  { %v162_v35 = vld [vmem:[#allocation0 + $0x10] sm:$0xf]  ;;  %v180_v36 = vld [vmem:[#allocation0 + $0x28] sm:$0xf]  ;;  %v198_v37 = vld [vmem:[#allocation0 + $0x40] sm:$0xf] }
  0xa1   :  { %317 = vst [vmem:[%s496_s1 + $0x8] sm:$0xf] %v162_v35  ;;  %320 = vst [vmem:[%s496_s1 + $0x14] sm:$0xf] %v180_v36  ;;  %v216_v38 = vld [vmem:[#allocation0 + $0x58] sm:$0xf] }
  0xa2   :  { %v288_v34 = vld [vmem:[#allocation0 + $0xb8] sm:$0xf]  ;;  %v234_v39 = vld [vmem:[#allocation0 + $0x70] sm:$0xf]  ;;  %323 = vst [vmem:[%s496_s1 + $0x20] sm:$0xf] %v198_v37 }
  0xa3   :  { %338 = vst [vmem:[%s496_s1 + $0x5c] sm:$0xf] %v288_v34  ;;  %326 = vst [vmem:[%s496_s1 + $0x2c] sm:$0xf] %v216_v38  ;;  %v252_v40 = vld [vmem:[#allocation0 + $0x88] sm:$0xf] }
  0xa4   :  { %329 = vst [vmem:[%s496_s1 + $0x38] sm:$0xf] %v234_v39  ;;  %v270_v41 = vld [vmem:[#allocation0 + $0xa0] sm:$0xf]  ;;  %332 = vst [vmem:[%s496_s1 + $0x44] sm:$0xf] %v252_v40 }
  0xa5   :  { %335 = vst [vmem:[%s496_s1 + $0x50] sm:$0xf] %v270_v41 }

// kernel: _lambda_.1
= control target key start
LH: loop header
LB: loop body
LE: loop exit
PB: predicated region body
PF: predicated region fallthrough
CT: control target
= control target key end

     0   :  { %s802_s18 = smov 0   ;;  %s804_s19 = smov 0   ;;  %s881_s0 = inlined_call_operand.vmem [shape: f32[2,2,4,128], index: 0, kind: input, shape index: {}]   ;;  %s882_s1 = inlined_call_operand.vmem [shape: f32[2,2,4,128], index: 1, kind: input, shape index: {}]   ;;  %s883_s2 = inlined_call_operand.vmem [shape: f32[2,4,8,128], index: 2, kind: input, shape index: {}]   ;;  %s884_s3 = inlined_call_operand.vmem [shape: f32[2,4,8,128], index: 3, kind: input, shape index: {}]   ;;  %s885_s4 = inlined_call_operand.vmem [shape: f32[2,2,8,128], index: 4, kind: output, shape index: {0}]   ;;  %s886_s5 = inlined_call_operand.vmem [shape: f32[2,2,8,128], index: 5, kind: output, shape index: {1}]  }
   0x1   :  { %s806_s20 = smov 0  }
   0x2 LB: > { %s28_s21 = sadd.s32 1, %s762_s19  ;;  %p671_p0 = scmp.ge.s32.totalorder %s766_s20, 1  ;;  %s766_s20 = sphi %s806_s20, %s16_s20   ;;  %s762_s19 = sphi %s804_s19, %s888_s19   ;;  %s758_s18 = sphi %s802_s18, %s887_s18  }
   0x3   : > { %p30_p1 = scmp.ge.s32.totalorder %s28_s21, 2  ;;  %p256_p2 = scmp.lt.s32.totalorder %s766_s20, 3 }
   0x5   : > { %s890_s21 = smov (%p30_p1, %s28_s21), 0  ;;  %p257_p3 = pnand %p671_p0, %p256_p2 }
   0x6   : > { %p322_p4 = scmp.lt.s32.totalorder (!%p257_p3), %s758_s18, 1 }
   0x7   : > { %260 = sbr.rel (%p257_p3) target bundleno = 36 (0x24), region = 36 }
   0xe   : > { %s892_s18 = smov (!%p322_p4, %s758_s18), 1 }
   0xf   : > { %s702_s22 = sshll.u32 %s892_s18, 3  ;;  %s704_s23 = sshll.u32 %s892_s18, 5 }
  0x10   : > { %s823_s26 = scalar_lea.vmem %s881_s0, %s702_s22  ;;  %s828_s29 = scalar_lea.vmem %s882_s1, %s702_s22 }
  0x11   : > { %s833_s7 = scalar_lea.vmem %s883_s2, %s704_s23  ;;  %s838_s10 = scalar_lea.vmem %s884_s3, %s704_s23 }
  0x12   : > { %s706_s11 = sshll.u32 %s892_s18, 4  ;;  %s850_s22 = smov 0  }
  0x13   : > { %s843_s14 = scalar_lea.vmem %s885_s4, %s706_s11  ;;  %s848_s17 = scalar_lea.vmem %s886_s5, %s706_s11 }
  0x14 LB: >> { %v381_v0 = vld [vmem:[%s833_s7] sm:$0xff]  ;;  %s684_s18 = sshll.u32 %s770_s22, 2  ;;  %v687_v2 = vld [vmem:[%s833_s7 + $0x8] sm:$0xff]  ;;  %v691_v4 = vld [vmem:[%s833_s7 + $0x10] sm:$0xff]  ;;  %s699_s25 = sshll.u32 %s770_s22, 3  ;;  %s770_s22 = sphi %s850_s22, %s375_s22  }
  0x15   : >> { %v382_v1 = vld [vmem:[%s838_s10] sm:$0xff]  ;;  %v688_v3 = vld [vmem:[%s838_s10 + $0x8] sm:$0xff]  ;;  %s377_s23 = scalar_lea.vmem %s823_s26, %s684_s18  ;;  %s379_s24 = scalar_lea.vmem %s828_s29, %s684_s18  ;;  %v692_v5 = vld [vmem:[%s838_s10 + $0x10] sm:$0xff] }
  0x16   : >> { %v695_v6 = vld [vmem:[%s833_s7 + $0x18] sm:$0xff]  ;;  %v685_v8 = vld [vmem:[%s377_s23] ss:$0 sm:$0xff]  ;;  %v689_v10 = vld [vmem:[%s377_s23 + $0x1] ss:$0 sm:$0xff]  ;;  %s466_s27 = scalar_lea.vmem %s843_s14, %s699_s25  ;;  %s468_s28 = scalar_lea.vmem %s848_s17, %s699_s25 }
  0x17   : >> { %v696_v7 = vld [vmem:[%s838_s10 + $0x18] sm:$0xff]  ;;  %v686_v9 = vld [vmem:[%s379_s24] ss:$0 sm:$0xff]  ;;  %v387_v11 = vmul.f32 %v685_v8, %v381_v0  ;;  %v690_v13 = vld [vmem:[%s379_s24 + $0x1] ss:$0 sm:$0xff]  ;;  %v409_v14 = vmul.f32 %v689_v10, %v687_v2  ;;  %v395_v17 = vmul.f32 %v685_v8, %v382_v1  ;;  %v417_v27 = vmul.f32 %v689_v10, %v688_v3  ;;  %s375_s22 = sadd.s32 1, %s770_s22  }
  0x18   : >> { %v392_v12 = vmul.f32 %v686_v9, %v382_v1  ;;  %v693_v15 = vld [vmem:[%s377_s23 + $0x2] ss:$0 sm:$0xff]  ;;  %v414_v18 = vmul.f32 %v690_v13, %v688_v3  ;;  %v697_v21 = vld [vmem:[%s377_s23 + $0x3] ss:$0 sm:$0xff]  ;;  %v396_v23 = vmul.f32 %v686_v9, %v381_v0  ;;  %v418_v31 = vmul.f32 %v690_v13, %v687_v2  ;;  %p372_p5 = scmp.ge.s32.totalorder %s375_s22, 2  }
  0x19   : >> { %v694_v16 = vld [vmem:[%s379_s24 + $0x2] ss:$0 sm:$0xff]  ;;  %v431_v19 = vmul.f32 %v693_v15, %v691_v4  ;;  %v698_v22 = vld [vmem:[%s379_s24 + $0x3] ss:$0 sm:$0xff]  ;;  %v453_v25 = vmul.f32 %v697_v21, %v695_v6  ;;  %v439_v32 = vmul.f32 %v693_v15, %v692_v5  ;;  %v461_v34 = vmul.f32 %v697_v21, %v696_v7 }
  0x1a   : >> { %v436_v20 = vmul.f32 %v694_v16, %v692_v5  ;;  %v393_v24 = vsub.f32 %v387_v11, %v392_v12  ;;  %v458_v26 = vmul.f32 %v698_v22, %v696_v7  ;;  %v415_v28 = vsub.f32 %v409_v14, %v414_v18 }
  0x1b   : >> { %v397_v30 = vadd.f32 %v396_v23, %v395_v17  ;;  %v440_v33 = vmul.f32 %v694_v16, %v691_v4  ;;  %v419_v37 = vadd.f32 %v418_v31, %v417_v27  ;;  %v462_v38 = vmul.f32 %v698_v22, %v695_v6 }
  0x1c   : >> { %v437_v29 = vsub.f32 %v431_v19, %v436_v20  ;;  %v416_v35 = vadd.f32 %v415_v28, %v393_v24  ;;  %v459_v36 = vsub.f32 %v453_v25, %v458_v26 }
  0x1d   : >> { %v441_v39 = vadd.f32 %v440_v33, %v439_v32  ;;  %v420_v41 = vadd.f32 %v419_v37, %v397_v30  ;;  %v463_v42 = vadd.f32 %v462_v38, %v461_v34  ;;  %374 = sbr.rel (!%p372_p5) target bundleno = 20 (0x14), region = 104 }
  0x1e   : >> { %v438_v40 = vadd.f32 %v437_v29, %v416_v35 }
  0x1f   : >> { %v442_v44 = vadd.f32 %v441_v39, %v420_v41 }
  0x20   : >> { %v460_v43 = vadd.f32 %v459_v36, %v438_v40 }
  0x21   : >> { %v464_v45 = vadd.f32 %v463_v42, %v442_v44 }
  0x22   : >> { %467 = vst [vmem:[%s466_s27] sm:$0xff] %v460_v43 }
  0x23   : >> { %469 = vst [vmem:[%s468_s28] sm:$0xff] %v464_v45 }
  0x24 PF: > { %s16_s20 = sadd.s32 1, %s766_s20   ;;  %s887_s18 = smov %s762_s19 }
  0x25   : > { %p13_p6 = scmp.ge.s32.totalorder %s16_s20, 4   ;;  %s888_s19 = smov %s890_s21 }
  0x27   :  { %15 = sbr.rel (!%p13_p6) target bundleno = 2 (0x2), region = 115 }

// kernel: reverse.0
= control target key start
LH: loop header
LB: loop body
LE: loop exit
PB: predicated region body
PF: predicated region fallthrough
CT: control target
= control target key end

     0   :  { %v135_v6 = vlaneseq  ;;  %v128_v26 = vld [vmem:[#allocation0 + $0x7] ss:$-1 sm:$0xff]  ;;  %v142_v28 = vld [vmem:[#allocation0 + $0x17] ss:$-1 sm:$0xff]  ;;  %s868_s0 = inlined_call_operand.vmem [shape: f32[2,4,3,16,7], index: 0, kind: input, shape index: {}]   ;;  %s869_s1 = inlined_call_operand.vmem [shape: f32[2,4,3,16,7], index: 1, kind: output, shape index: {}]  }
   0x1   :  { %v76_v0 = vld [vmem:[%s868_s0] sm:$0xff]  ;;  %v78_v1 = vld [vmem:[%s868_s0 + $0x8] sm:$0xff]  ;;  %v80_v2 = vld [vmem:[%s868_s0 + $0x10] sm:$0xff]  ;;  %v129_v29 = vrot.slane %v128_v26, 1  ;;  %v143_v31 = vrot.slane %v142_v28, 1 }
   0x2   :  { %77 = vst [vmem:[#allocation0 + $0x8] sm:$0xff] %v76_v0  ;;  %79 = vst [vmem:[#allocation0 + $0x18] sm:$0xff] %v78_v1  ;;  %v82_v3 = vld [vmem:[%s868_s0 + $0x18] sm:$0xff]  ;;  %v84_v4 = vld [vmem:[%s868_s0 + $0x20] sm:$0xff]  ;;  %v727_v19 = vshrl.u32 %v135_v6, 7 }
   0x3   :  { %81 = vst [vmem:[#allocation0 + $0x28] sm:$0xff] %v80_v2  ;;  %v86_v5 = vld [vmem:[%s868_s0 + $0x28] sm:$0xff]  ;;  %83 = vst [vmem:[#allocation0 + $0x38] sm:$0xff] %v82_v3  ;;  %v88_v7 = vld [vmem:[%s868_s0 + $0x30] sm:$0xff] }
   0x4   :  { %85 = vst [vmem:[#allocation0 + $0x48] sm:$0xff] %v84_v4  ;;  %87 = vst [vmem:[#allocation0 + $0x58] sm:$0xff] %v86_v5  ;;  %v90_v8 = vld [vmem:[%s868_s0 + $0x38] sm:$0xff]  ;;  %v92_v9 = vld [vmem:[%s868_s0 + $0x40] sm:$0xff]  ;;  %vm137_vm0 = vcmp.lt.s32.totalorder %v727_v19, 7 }
   0x5   :  { %89 = vst [vmem:[#allocation0 + $0x68] sm:$0xff] %v88_v7  ;;  %91 = vst [vmem:[#allocation0 + $0x78] sm:$0xff] %v90_v8  ;;  %v94_v10 = vld [vmem:[%s868_s0 + $0x48] sm:$0xff]  ;;  %v96_v11 = vld [vmem:[%s868_s0 + $0x50] sm:$0xff] }
   0x6   :  { %93 = vst [vmem:[#allocation0 + $0x88] sm:$0xff] %v92_v9  ;;  %v98_v12 = vld [vmem:[%s868_s0 + $0x58] sm:$0xff]  ;;  %95 = vst [vmem:[#allocation0 + $0x98] sm:$0xff] %v94_v10  ;;  %v100_v13 = vld [vmem:[%s868_s0 + $0x60] sm:$0xff] }
   0x7   :  { %97 = vst [vmem:[#allocation0 + $0xa8] sm:$0xff] %v96_v11  ;;  %99 = vst [vmem:[#allocation0 + $0xb8] sm:$0xff] %v98_v12  ;;  %v102_v14 = vld [vmem:[%s868_s0 + $0x68] sm:$0xff]  ;;  %v104_v15 = vld [vmem:[%s868_s0 + $0x70] sm:$0xff] }
   0x8   :  { %101 = vst [vmem:[#allocation0 + $0xc8] sm:$0xff] %v100_v13  ;;  %103 = vst [vmem:[#allocation0 + $0xd8] sm:$0xff] %v102_v14  ;;  %v106_v16 = vld [vmem:[%s868_s0 + $0x78] sm:$0xff]  ;;  %v108_v17 = vld [vmem:[%s868_s0 + $0x80] sm:$0xff] }
   0x9   :  { %105 = vst [vmem:[#allocation0 + $0xe8] sm:$0xff] %v104_v15  ;;  %v110_v18 = vld [vmem:[%s868_s0 + $0x88] sm:$0xff]  ;;  %107 = vst [vmem:[#allocation0 + $0xf8] sm:$0xff] %v106_v16  ;;  %v112_v20 = vld [vmem:[%s868_s0 + $0x90] sm:$0xff] }
   0xa   :  { %109 = vst [vmem:[#allocation0 + $0x108] sm:$0xff] %v108_v17  ;;  %111 = vst [vmem:[#allocation0 + $0x118] sm:$0xff] %v110_v18  ;;  %v114_v21 = vld [vmem:[%s868_s0 + $0x98] sm:$0xff]  ;;  %v116_v22 = vld [vmem:[%s868_s0 + $0xa0] sm:$0xff] }
   0xb   :  { %113 = vst [vmem:[#allocation0 + $0x128] sm:$0xff] %v112_v20  ;;  %115 = vst [vmem:[#allocation0 + $0x138] sm:$0xff] %v114_v21  ;;  %v118_v23 = vld [vmem:[%s868_s0 + $0xa8] sm:$0xff]  ;;  %v120_v24 = vld [vmem:[%s868_s0 + $0xb0] sm:$0xff] }
   0xc   :  { %117 = vst [vmem:[#allocation0 + $0x148] sm:$0xff] %v116_v22  ;;  %v122_v25 = vld [vmem:[%s868_s0 + $0xb8] sm:$0xff]  ;;  %119 = vst [vmem:[#allocation0 + $0x158] sm:$0xff] %v118_v23  ;;  %v133_v27 = vld [vmem:[#allocation0 + $0xf] ss:$-1 sm:$0xff] }
   0xd   :  { %121 = vst [vmem:[#allocation0 + $0x168] sm:$0xff] %v120_v24  ;;  %123 = vst [vmem:[#allocation0 + $0x178] sm:$0xff] %v122_v25  ;;  %v134_v30 = vrot.slane %v133_v27, 1  ;;  %v147_v32 = vld [vmem:[#allocation0 + $0x1f] ss:$-1 sm:$0xff] }
   0xe   :  { %v148_v33 = vrot.slane %v147_v32, 1  ;;  %v156_v34 = vld [vmem:[#allocation0 + $0x27] ss:$-1 sm:$0xff]  ;;  %v161_v35 = vld [vmem:[#allocation0 + $0x2f] ss:$-1 sm:$0xff]  ;;  %130 = vst [vmem:[#allocation1] sm:$0xff] %v129_v29 }
   0xf   :  { %144 = vst [vmem:[#allocation1 + $0x8] sm:$0xff] %v143_v31  ;;  %v157_v36 = vrot.slane %v156_v34, 1  ;;  %v162_v37 = vrot.slane %v161_v35, 1  ;;  %v170_v38 = vld [vmem:[#allocation0 + $0x37] ss:$-1 sm:$0xff]  ;;  %138 = vst.msk [vmem:[#allocation1] sm:$0xff] %vm137_vm0, %v134_v30 }
  0x10   :  { %v175_v39 = vld [vmem:[#allocation0 + $0x3f] ss:$-1 sm:$0xff]  ;;  %152 = vst.msk [vmem:[#allocation1 + $0x8] sm:$0xff] %vm137_vm0, %v148_v33  ;;  %v171_v40 = vrot.slane %v170_v38, 1  ;;  %v184_v42 = vld [vmem:[#allocation0 + $0x47] ss:$-1 sm:$0xff] }
  0x11   :  { %v176_v41 = vrot.slane %v175_v39, 1  ;;  %v189_v43 = vld [vmem:[#allocation0 + $0x4f] ss:$-1 sm:$0xff]  ;;  %158 = vst [vmem:[#allocation1 + $0x10] sm:$0xff] %v157_v36  ;;  %v185_v44 = vrot.slane %v184_v42, 1 }
  0x12   :  { %v190_v45 = vrot.slane %v189_v43, 1  ;;  %v198_v46 = vld [vmem:[#allocation0 + $0x57] ss:$-1 sm:$0xff]  ;;  %v203_v47 = vld [vmem:[#allocation0 + $0x5f] ss:$-1 sm:$0xff]  ;;  %166 = vst.msk [vmem:[#allocation1 + $0x10] sm:$0xff] %vm137_vm0, %v162_v37 }
  0x13   :  { %172 = vst [vmem:[#allocation1 + $0x18] sm:$0xff] %v171_v40  ;;  %v199_v48 = vrot.slane %v198_v46, 1  ;;  %v204_v49 = vrot.slane %v203_v47, 1  ;;  %v212_v50 = vld [vmem:[#allocation0 + $0x67] ss:$-1 sm:$0xff]  ;;  %186 = vst [vmem:[#allocation1 + $0x20] sm:$0xff] %v185_v44 }
  0x14   :  { %v217_v51 = vld [vmem:[#allocation0 + $0x6f] ss:$-1 sm:$0xff]  ;;  %180 = vst.msk [vmem:[#allocation1 + $0x18] sm:$0xff] %vm137_vm0, %v176_v41  ;;  %v213_v52 = vrot.slane %v212_v50, 1  ;;  %v226_v54 = vld [vmem:[#allocation0 + $0x77] ss:$-1 sm:$0xff] }
  0x15   :  { %v218_v53 = vrot.slane %v217_v51, 1  ;;  %v231_v55 = vld [vmem:[#allocation0 + $0x7f] ss:$-1 sm:$0xff]  ;;  %194 = vst.msk [vmem:[#allocation1 + $0x20] sm:$0xff] %vm137_vm0, %v190_v45  ;;  %200 = vst [vmem:[#allocation1 + $0x28] sm:$0xff] %v199_v48  ;;  %v227_v56 = vrot.slane %v226_v54, 1 }
  0x16   :  { %v232_v57 = vrot.slane %v231_v55, 1  ;;  %v240_v58 = vld [vmem:[#allocation0 + $0x87] ss:$-1 sm:$0xff]  ;;  %v245_v59 = vld [vmem:[#allocation0 + $0x8f] ss:$-1 sm:$0xff]  ;;  %208 = vst.msk [vmem:[#allocation1 + $0x28] sm:$0xff] %vm137_vm0, %v204_v49 }
  0x17   :  { %214 = vst [vmem:[#allocation1 + $0x30] sm:$0xff] %v213_v52  ;;  %v241_v60 = vrot.slane %v240_v58, 1  ;;  %v246_v61 = vrot.slane %v245_v59, 1  ;;  %v254_v62 = vld [vmem:[#allocation0 + $0x97] ss:$-1 sm:$0xff]  ;;  %228 = vst [vmem:[#allocation1 + $0x38] sm:$0xff] %v227_v56 }
  0x18   :  { %v259_v63 = vld [vmem:[#allocation0 + $0x9f] ss:$-1 sm:$0xff]  ;;  %222 = vst.msk [vmem:[#allocation1 + $0x30] sm:$0xff] %vm137_vm0, %v218_v53  ;;  %v255_v0 = vrot.slane %v254_v62, 1  ;;  %v268_v2 = vld [vmem:[#allocation0 + $0xa7] ss:$-1 sm:$0xff] }
  0x19   :  { %v260_v1 = vrot.slane %v259_v63, 1  ;;  %v273_v3 = vld [vmem:[#allocation0 + $0xaf] ss:$-1 sm:$0xff]  ;;  %236 = vst.msk [vmem:[#allocation1 + $0x38] sm:$0xff] %vm137_vm0, %v232_v57  ;;  %242 = vst [vmem:[#allocation1 + $0x40] sm:$0xff] %v241_v60  ;;  %v269_v4 = vrot.slane %v268_v2, 1 }
  0x1a   :  { %v274_v5 = vrot.slane %v273_v3, 1  ;;  %v282_v6 = vld [vmem:[#allocation0 + $0xb7] ss:$-1 sm:$0xff]  ;;  %v287_v7 = vld [vmem:[#allocation0 + $0xbf] ss:$-1 sm:$0xff]  ;;  %250 = vst.msk [vmem:[#allocation1 + $0x40] sm:$0xff] %vm137_vm0, %v246_v61 }
  0x1b   :  { %256 = vst [vmem:[#allocation1 + $0x48] sm:$0xff] %v255_v0  ;;  %v283_v8 = vrot.slane %v282_v6, 1  ;;  %v288_v9 = vrot.slane %v287_v7, 1  ;;  %v296_v10 = vld [vmem:[#allocation0 + $0xc7] ss:$-1 sm:$0xff]  ;;  %270 = vst [vmem:[#allocation1 + $0x50] sm:$0xff] %v269_v4 }
  0x1c   :  { %v301_v11 = vld [vmem:[#allocation0 + $0xcf] ss:$-1 sm:$0xff]  ;;  %264 = vst.msk [vmem:[#allocation1 + $0x48] sm:$0xff] %vm137_vm0, %v260_v1  ;;  %v297_v12 = vrot.slane %v296_v10, 1  ;;  %v310_v14 = vld [vmem:[#allocation0 + $0xd7] ss:$-1 sm:$0xff] }
  0x1d   :  { %v302_v13 = vrot.slane %v301_v11, 1  ;;  %v315_v15 = vld [vmem:[#allocation0 + $0xdf] ss:$-1 sm:$0xff]  ;;  %278 = vst.msk [vmem:[#allocation1 + $0x50] sm:$0xff] %vm137_vm0, %v274_v5  ;;  %284 = vst [vmem:[#allocation1 + $0x58] sm:$0xff] %v283_v8  ;;  %v311_v16 = vrot.slane %v310_v14, 1 }
  0x1e   :  { %v316_v17 = vrot.slane %v315_v15, 1  ;;  %v324_v18 = vld [vmem:[#allocation0 + $0xe7] ss:$-1 sm:$0xff]  ;;  %v329_v20 = vld [vmem:[#allocation0 + $0xef] ss:$-1 sm:$0xff]  ;;  %292 = vst.msk [vmem:[#allocation1 + $0x58] sm:$0xff] %vm137_vm0, %v288_v9 }
  0x1f   :  { %298 = vst [vmem:[#allocation1 + $0x60] sm:$0xff] %v297_v12  ;;  %v325_v21 = vrot.slane %v324_v18, 1  ;;  %v330_v22 = vrot.slane %v329_v20, 1  ;;  %v338_v23 = vld [vmem:[#allocation0 + $0xf7] ss:$-1 sm:$0xff]  ;;  %312 = vst [vmem:[#allocation1 + $0x68] sm:$0xff] %v311_v16 }
  0x20   :  { %v343_v24 = vld [vmem:[#allocation0 + $0xff] ss:$-1 sm:$0xff]  ;;  %306 = vst.msk [vmem:[#allocation1 + $0x60] sm:$0xff] %vm137_vm0, %v302_v13  ;;  %v339_v25 = vrot.slane %v338_v23, 1  ;;  %v352_v27 = vld [vmem:[#allocation0 + $0x107] ss:$-1 sm:$0xff] }
  0x21   :  { %v344_v26 = vrot.slane %v343_v24, 1  ;;  %v357_v28 = vld [vmem:[#allocation0 + $0x10f] ss:$-1 sm:$0xff]  ;;  %320 = vst.msk [vmem:[#allocation1 + $0x68] sm:$0xff] %vm137_vm0, %v316_v17  ;;  %326 = vst [vmem:[#allocation1 + $0x70] sm:$0xff] %v325_v21  ;;  %v353_v29 = vrot.slane %v352_v27, 1 }
  0x22   :  { %v358_v30 = vrot.slane %v357_v28, 1  ;;  %v366_v31 = vld [vmem:[#allocation0 + $0x117] ss:$-1 sm:$0xff]  ;;  %v371_v32 = vld [vmem:[#allocation0 + $0x11f] ss:$-1 sm:$0xff]  ;;  %334 = vst.msk [vmem:[#allocation1 + $0x70] sm:$0xff] %vm137_vm0, %v330_v22 }
  0x23   :  { %340 = vst [vmem:[#allocation1 + $0x78] sm:$0xff] %v339_v25  ;;  %v367_v33 = vrot.slane %v366_v31, 1  ;;  %v372_v34 = vrot.slane %v371_v32, 1  ;;  %v380_v35 = vld [vmem:[#allocation0 + $0x127] ss:$-1 sm:$0xff]  ;;  %354 = vst [vmem:[#allocation1 + $0x80] sm:$0xff] %v353_v29 }
  0x24   :  { %v385_v36 = vld [vmem:[#allocation0 + $0x12f] ss:$-1 sm:$0xff]  ;;  %348 = vst.msk [vmem:[#allocation1 + $0x78] sm:$0xff] %vm137_vm0, %v344_v26  ;;  %v381_v37 = vrot.slane %v380_v35, 1  ;;  %v394_v39 = vld [vmem:[#allocation0 + $0x137] ss:$-1 sm:$0xff] }
  0x25   :  { %v386_v38 = vrot.slane %v385_v36, 1  ;;  %v399_v40 = vld [vmem:[#allocation0 + $0x13f] ss:$-1 sm:$0xff]  ;;  %362 = vst.msk [vmem:[#allocation1 + $0x80] sm:$0xff] %vm137_vm0, %v358_v30  ;;  %368 = vst [vmem:[#allocation1 + $0x88] sm:$0xff] %v367_v33  ;;  %v395_v41 = vrot.slane %v394_v39, 1 }
  0x26   :  { %v400_v42 = vrot.slane %v399_v40, 1  ;;  %v408_v43 = vld [vmem:[#allocation0 + $0x147] ss:$-1 sm:$0xff]  ;;  %v413_v44 = vld [vmem:[#allocation0 + $0x14f] ss:$-1 sm:$0xff]  ;;  %376 = vst.msk [vmem:[#allocation1 + $0x88] sm:$0xff] %vm137_vm0, %v372_v34 }
  0x27   :  { %382 = vst [vmem:[#allocation1 + $0x90] sm:$0xff] %v381_v37  ;;  %v409_v45 = vrot.slane %v408_v43, 1  ;;  %v414_v46 = vrot.slane %v413_v44, 1  ;;  %v422_v47 = vld [vmem:[#allocation0 + $0x157] ss:$-1 sm:$0xff]  ;;  %396 = vst [vmem:[#allocation1 + $0x98] sm:$0xff] %v395_v41 }
  0x28   :  { %v427_v48 = vld [vmem:[#allocation0 + $0x15f] ss:$-1 sm:$0xff]  ;;  %390 = vst.msk [vmem:[#allocation1 + $0x90] sm:$0xff] %vm137_vm0, %v386_v38  ;;  %v423_v49 = vrot.slane %v422_v47, 1  ;;  %v436_v51 = vld [vmem:[#allocation0 + $0x167] ss:$-1 sm:$0xff] }
  0x29   :  { %v428_v50 = vrot.slane %v427_v48, 1  ;;  %v441_v52 = vld [vmem:[#allocation0 + $0x16f] ss:$-1 sm:$0xff]  ;;  %404 = vst.msk [vmem:[#allocation1 + $0x98] sm:$0xff] %vm137_vm0, %v400_v42  ;;  %410 = vst [vmem:[#allocation1 + $0xa0] sm:$0xff] %v409_v45  ;;  %v437_v53 = vrot.slane %v436_v51, 1 }
  0x2a   :  { %v442_v54 = vrot.slane %v441_v52, 1  ;;  %v450_v55 = vld [vmem:[#allocation0 + $0x177] ss:$-1 sm:$0xff]  ;;  %v455_v56 = vld [vmem:[#allocation0 + $0x17f] ss:$-1 sm:$0xff]  ;;  %418 = vst.msk [vmem:[#allocation1 + $0xa0] sm:$0xff] %vm137_vm0, %v414_v46 }
  0x2b   :  { %424 = vst [vmem:[#allocation1 + $0xa8] sm:$0xff] %v423_v49  ;;  %v451_v57 = vrot.slane %v450_v55, 1  ;;  %v456_v58 = vrot.slane %v455_v56, 1  ;;  %v534_v59 = vld [vmem:[#allocation1] sm:$0xff]  ;;  %v536_v60 = vld [vmem:[#allocation1 + $0x8] sm:$0xff]  ;;  %v538_v61 = vld [vmem:[#allocation1 + $0x10] sm:$0xff] }
  0x2c   :  { %432 = vst.msk [vmem:[#allocation1 + $0xa8] sm:$0xff] %vm137_vm0, %v428_v50  ;;  %438 = vst [vmem:[#allocation1 + $0xb0] sm:$0xff] %v437_v53  ;;  %v540_v62 = vld [vmem:[#allocation1 + $0x18] sm:$0xff]  ;;  %v542_v63 = vld [vmem:[#allocation1 + $0x20] sm:$0xff] }
  0x2d   :  { %535 = vst [vmem:[%s869_s1] sm:$0xff] %v534_v59  ;;  %537 = vst [vmem:[%s869_s1 + $0x8] sm:$0xff] %v536_v60  ;;  %v544_v0 = vld [vmem:[#allocation1 + $0x28] sm:$0xff]  ;;  %v546_v1 = vld [vmem:[#allocation1 + $0x30] sm:$0xff] }
  0x2e   :  { %539 = vst [vmem:[%s869_s1 + $0x10] sm:$0xff] %v538_v61  ;;  %446 = vst.msk [vmem:[#allocation1 + $0xb0] sm:$0xff] %vm137_vm0, %v442_v54  ;;  %v548_v2 = vld [vmem:[#allocation1 + $0x38] sm:$0xff]  ;;  %v550_v3 = vld [vmem:[#allocation1 + $0x40] sm:$0xff] }
  0x2f   :  { %452 = vst [vmem:[#allocation1 + $0xb8] sm:$0xff] %v451_v57  ;;  %541 = vst [vmem:[%s869_s1 + $0x18] sm:$0xff] %v540_v62  ;;  %v552_v19 = vld [vmem:[#allocation1 + $0x48] sm:$0xff]  ;;  %v554_v4 = vld [vmem:[#allocation1 + $0x50] sm:$0xff] }
  0x30   :  { %543 = vst [vmem:[%s869_s1 + $0x20] sm:$0xff] %v542_v63  ;;  %545 = vst [vmem:[%s869_s1 + $0x28] sm:$0xff] %v544_v0  ;;  %v556_v5 = vld [vmem:[#allocation1 + $0x58] sm:$0xff]  ;;  %v558_v6 = vld [vmem:[#allocation1 + $0x60] sm:$0xff] }
  0x31   :  { %460 = vst.msk [vmem:[#allocation1 + $0xb8] sm:$0xff] %vm137_vm0, %v456_v58  ;;  %547 = vst [vmem:[%s869_s1 + $0x30] sm:$0xff] %v546_v1  ;;  %v560_v7 = vld [vmem:[#allocation1 + $0x68] sm:$0xff]  ;;  %v562_v8 = vld [vmem:[#allocation1 + $0x70] sm:$0xff] }
  0x32   :  { %549 = vst [vmem:[%s869_s1 + $0x38] sm:$0xff] %v548_v2  ;;  %551 = vst [vmem:[%s869_s1 + $0x40] sm:$0xff] %v550_v3  ;;  %v564_v9 = vld [vmem:[#allocation1 + $0x78] sm:$0xff]  ;;  %v566_v10 = vld [vmem:[#allocation1 + $0x80] sm:$0xff] }
  0x33   :  { %553 = vst [vmem:[%s869_s1 + $0x48] sm:$0xff] %v552_v19  ;;  %555 = vst [vmem:[%s869_s1 + $0x50] sm:$0xff] %v554_v4  ;;  %v568_v11 = vld [vmem:[#allocation1 + $0x88] sm:$0xff]  ;;  %v570_v12 = vld [vmem:[#allocation1 + $0x90] sm:$0xff] }
  0x34   :  { %557 = vst [vmem:[%s869_s1 + $0x58] sm:$0xff] %v556_v5  ;;  %559 = vst [vmem:[%s869_s1 + $0x60] sm:$0xff] %v558_v6  ;;  %v572_v13 = vld [vmem:[#allocation1 + $0x98] sm:$0xff]  ;;  %v574_v14 = vld [vmem:[#allocation1 + $0xa0] sm:$0xff] }
  0x35   :  { %561 = vst [vmem:[%s869_s1 + $0x68] sm:$0xff] %v560_v7  ;;  %563 = vst [vmem:[%s869_s1 + $0x70] sm:$0xff] %v562_v8  ;;  %v576_v15 = vld [vmem:[#allocation1 + $0xa8] sm:$0xff]  ;;  %v578_v16 = vld [vmem:[#allocation1 + $0xb0] sm:$0xff] }
  0x36   :  { %565 = vst [vmem:[%s869_s1 + $0x78] sm:$0xff] %v564_v9  ;;  %567 = vst [vmem:[%s869_s1 + $0x80] sm:$0xff] %v566_v10 }
  0x37   :  { %569 = vst [vmem:[%s869_s1 + $0x88] sm:$0xff] %v568_v11  ;;  %571 = vst [vmem:[%s869_s1 + $0x90] sm:$0xff] %v570_v12 }
  0x38   :  { %573 = vst [vmem:[%s869_s1 + $0x98] sm:$0xff] %v572_v13  ;;  %575 = vst [vmem:[%s869_s1 + $0xa0] sm:$0xff] %v574_v14  ;;  %v580_v17 = vld [vmem:[#allocation1 + $0xb8] sm:$0xff] }
  0x39   :  { %577 = vst [vmem:[%s869_s1 + $0xa8] sm:$0xff] %v576_v15  ;;  %579 = vst [vmem:[%s869_s1 + $0xb0] sm:$0xff] %v578_v16 }
  0x3a   :  { %581 = vst [vmem:[%s869_s1 + $0xb8] sm:$0xff] %v580_v17 }

</bundles_post_ra>
